<compile_context>
chip_gen: v5e
topology: v5e:2x2
jax: 0.10.0
libtpu: 0.0.40
codegen_flags: <defaults>
</compile_context>

<pallas_src>
import jax
import jax.numpy as jnp
from jax.experimental import pallas as pl
from jax.experimental.pallas import tpu as pltpu


def _block_identity_kernel(x_ref, o_ref):
    # Abstract Block.forward has no computation: pass the tile through.
    o_ref[...] = x_ref[...]


def block_forward(x):
    """Semantically faithful Block.forward: identity, no device kernel."""
    return x


# ---------------------------------------------------------------------------
# Tiling helpers (all trace-time Python; shapes are static under jit).
# ---------------------------------------------------------------------------

_LANE = 128


def _sublane_pack(itemsize: int) -> int:
    # f32 -> 8, bf16 -> 16, int8/fp8 -> 32 sublanes per packed (8,128) tile.
    return 8 * max(1, 4 // max(1, itemsize))


def _device_tile_params():
    """(target_tile_bytes, vmem_limit_bytes_or_None, is_v7) per TPU generation."""
    try:
        kind = jax.devices()[0].device_kind.lower()
    except Exception:
        kind = ""
    if "v7" in kind or "7x" in kind:
        # 8 MiB tiles: in+out, double-buffered = 32 MiB, under 64 MiB physical.
        return 8 << 20, 48 << 20, True
    if "v6" in kind:
        # 4 MiB tiles: 16 MiB of buffering, under a raised 24 MiB scoped limit.
        return 4 << 20, 24 << 20, False
    # v5e (16 MiB scoped VMEM default) and unknown chips: stay at 2 MiB tiles.
    return 2 << 20, None, False


def _largest_divisor_tile(n: int, unit: int, budget_bytes: int,
                          bytes_per_unit: int) -> int:
    """Largest multiple-of-`unit` divisor of n (n % unit == 0) within budget."""
    m = n // unit
    cap = max(1, min(m, budget_bytes // max(1, unit * bytes_per_unit)))
    for d in range(cap, 0, -1):
        if m % d == 0:
            return d * unit
    return unit


def _tile_2d(rows, cols, itemsize, pack, target_bytes, prefer_two_steps):
    # Columns first: keep the output lane-dense and as wide as the budget
    # allows (unmasked vst is the biggest single out_spec lever).
    tile_cols = _largest_divisor_tile(cols, _LANE, target_bytes, itemsize * pack)
    # Rows second, with whatever byte budget remains per `pack` rows.
    tile_rows = _largest_divisor_tile(rows, pack, target_bytes, itemsize * tile_cols)
    # v7x: avoid a single-step grid for mid-size inputs so the parallel grid
    # can shard across both TensorCores without one core idling.
    if (prefer_two_steps
            and rows == tile_rows and cols == tile_cols
            and (rows // pack) % 2 == 0
            and rows * cols * itemsize >= (2 << 20)):
        tile_rows //= 2
    return tile_rows, tile_cols


def _identity_copy_2d(x2, tile_rows, tile_cols, vmem_limit):
    rows, cols = x2.shape
    grid = (rows // tile_rows, cols // tile_cols)
    cp_kwargs = dict(dimension_semantics=("parallel", "parallel"))
    if vmem_limit is not None:
        cp_kwargs["vmem_limit_bytes"] = vmem_limit
    return pl.pallas_call(
        _block_identity_kernel,
        out_shape=jax.ShapeDtypeStruct((rows, cols), x2.dtype),
        grid=grid,
        in_specs=[pl.BlockSpec((tile_rows, tile_cols), lambda i, j: (i, j))],
        out_specs=pl.BlockSpec((tile_rows, tile_cols), lambda i, j: (i, j)),
        input_output_aliases={0: 0},
        compiler_params=pltpu.CompilerParams(**cp_kwargs),
    )(x2)


def _block_forward_pallas_impl(x):
    orig_shape = x.shape
    itemsize = jnp.dtype(x.dtype).itemsize
    pack = _sublane_pack(itemsize)
    target_bytes, vmem_limit, is_v7 = _device_tile_params()

    n = x.size
    if n == 0:
        return x

    # ---- Fast path: trailing dims already lane/sublane aligned -> no pad,
    # no slice; only zero-cost collapsing reshapes around the pallas_call. ----
    if (x.ndim >= 2 and orig_shape[-1] % _LANE == 0
            and (n // orig_shape[-1]) % pack == 0):
        rows, cols = n // orig_shape[-1], orig_shape[-1]
        tile_rows, tile_cols = _tile_2d(rows, cols, itemsize, pack,
                                        target_bytes, is_v7)
        out2 = _identity_copy_2d(x.reshape(rows, cols), tile_rows, tile_cols,
                                 vmem_limit)
        return out2.reshape(orig_shape)

    # ---- Slow path: flatten to a lane-dense slab; wide cols for large
    # inputs; padding bounded by < one sublane-pack of rows. ----
    cols = _LANE
    for cand in (8192, 4096, 2048, 1024, 512, 256, _LANE):
        if n >= cand * pack:
            cols = cand
            break
    rows = pl.cdiv(pl.cdiv(n, cols), pack) * pack
    total = rows * cols

    flat = x.reshape(-1)
    if total != n:
        flat = jnp.pad(flat, (0, total - n))
    tile_rows, tile_cols = _tile_2d(rows, cols, itemsize, pack, target_bytes,
                                    is_v7)
    out2 = _identity_copy_2d(flat.reshape(rows, cols), tile_rows, tile_cols,
                             vmem_limit)
    out_flat = out2.reshape(-1)
    if total != n:
        out_flat = out_flat[:n]
    return out_flat.reshape(orig_shape)


_block_forward_pallas_jit = jax.jit(_block_forward_pallas_impl)
_block_forward_pallas_donated = jax.jit(_block_forward_pallas_impl,
                                        donate_argnums=(0,))


def block_forward_pallas(x, *, donate=False):
    """Materialized Pallas identity copy of x (optionally donating x's buffer)."""
    fn = _block_forward_pallas_donated if donate else _block_forward_pallas_jit
    return fn(x)


if __name__ == "__main__":
    key = jax.random.PRNGKey(0)
    k0, k1, k2, k3 = jax.random.split(key, 4)

    # Small NCHW input consistent with a conv-style Block subclass.
    # Trailing dim 16 is not lane-aligned -> exercises the slow (reflowed) path,
    # which for this size needs no padding at all (2048 elems -> 8x256 slab).
    x = jax.random.normal(k0, (2, 4, 16, 16), dtype=jnp.float32)

    # Semantic forward: pure pass-through (no kernel, no copy).
    y_sem = block_forward(x)
    assert y_sem is x

    y = block_forward_pallas(x)
    jax.block_until_ready(y)
    assert y.shape == x.shape and y.dtype == x.dtype
    assert bool(jnp.array_equal(y, x)), "identity pass-through mismatch"

    # Lane/sublane-aligned input -> no-pad / no-slice fast path (f32 pack=8).
    x_fast = jax.random.normal(k1, (16, 256), dtype=jnp.float32)
    y_fast = block_forward_pallas(x_fast)
    assert bool(jnp.array_equal(y_fast, x_fast))

    # Donated fast path: donate a fresh copy so x_fast stays readable; with
    # donation + input_output_aliases the identity approaches a no-op.
    y_don = block_forward_pallas(x_fast + 0.0, donate=True)
    assert bool(jnp.array_equal(y_don, x_fast))

    # bf16 exercises dtype-aware sublane packing (pack=16) and byte-sized tiles.
    x_bf16 = jax.random.normal(k2, (32, 384), dtype=jnp.bfloat16)
    y_bf16 = block_forward_pallas(x_bf16)
    assert y_bf16.dtype == jnp.bfloat16
    assert bool(jnp.array_equal(y_bf16, x_bf16))

    # Awkward small shape -> padded path with < one sublane-pack of row padding.
    x_odd = jax.random.normal(k3, (3, 5, 7), dtype=jnp.float32)
    y_odd = block_forward_pallas(x_odd)
    assert bool(jnp.array_equal(y_odd, x_odd))

    jax.block_until_ready((y, y_fast, y_don, y_bf16, y_odd))
    print("KERNEL_OK")
</pallas_src>

<mosaic_0001>
module attributes {stable_mosaic.version = 11 : i64} {
  func.func @_block_identity_kernel(%arg0: i32, %arg1: i32, %arg2: memref<8x256xf32, #tpu.memory_space<vmem>>, %arg3: memref<8x256xf32, #tpu.memory_space<vmem>>) attributes {dimension_semantics = [#tpu.dimension_semantics<parallel>, #tpu.dimension_semantics<parallel>], iteration_bounds = array<i64: 1, 1>, scalar_prefetch = 0 : i64, scratch_operands = 0 : i64, tpu.core_type = #tpu.core_type<tc>, window_params = [{transform_indices = @transform_0, window_bounds = array<i64: 8, 256>}, {transform_indices = @transform_1, window_bounds = array<i64: 8, 256>}]} {
    %c0 = arith.constant 0 : index
    %c0_0 = arith.constant 0 : index
    %0 = vector.load %arg2[%c0, %c0_0] : memref<8x256xf32, #tpu.memory_space<vmem>>, vector<8x256xf32>
    %c0_1 = arith.constant 0 : index
    %c0_2 = arith.constant 0 : index
    %1 = vector.load %arg3[%c0_1, %c0_2] : memref<8x256xf32, #tpu.memory_space<vmem>>, vector<8x256xf32>
    tpu.vector_store %arg3[%c0_1, %c0_2], %0 {strides = array<i32>} : memref<8x256xf32, #tpu.memory_space<vmem>>, vector<8x256xf32>,
    return
  }
  func.func @transform_0(%arg0: i32, %arg1: i32) -> (i32, i32) {
    %c0_i32 = arith.constant 0 : i32
    return %arg0, %arg1 : i32, i32
  }
  func.func @transform_1(%arg0: i32, %arg1: i32) -> (i32, i32) {
    %c0_i32 = arith.constant 0 : i32
    return %arg0, %arg1 : i32, i32
  }
}

</mosaic_0001>

<bundles_post_ra>
// kernel: _block_forward_pallas_impl.1
= control target key start
LH: loop header
LB: loop body
LE: loop exit
PB: predicated region body
PF: predicated region fallthrough
CT: control target
= control target key end

     0   :  { %s38_s0 = inlined_call_operand.vmem [shape: f32[8,256], index: 0, kind: input, shape index: {}, may-alias: {0,1}]   ;;  %s39_s1 = inlined_call_operand.vmem [shape: f32[8,256], index: 1, kind: output, shape index: {}, may-alias: {0,1}]  }
   0x1   :  { %v8_v0 = vld [vmem:[%s38_s0] sm:$0xff]  ;;  %v9_v1 = vld [vmem:[%s38_s0 + $0x8] sm:$0xff] }
   0x2   :  { %10 = vst [vmem:[%s39_s1] sm:$0xff] %v8_v0 }
   0x3   :  { %11 = vst [vmem:[%s39_s1 + $0x8] sm:$0xff] %v9_v1 }

</bundles_post_ra>
